<compile_context>
chip_gen: v6e
topology: v6e:2x2x1
jax: 0.10.0
libtpu: 0.0.40
codegen_flags: <defaults>
</compile_context>

<pallas_src>
import jax
import jax.numpy as jnp
from jax.experimental import pallas as pl
from jax.experimental.pallas import tpu as pltpu


def _round_up(x, m):
    return (x + m - 1) // m * m


# --------------------------------------------------------------------------
# Down-projection kernel: xa = x @ A.T   (grid = (M-tiles, K-tiles))
# --------------------------------------------------------------------------
def _lora_down_kernel(x_ref, at_ref, xa_ref, acc_ref):
    k = pl.program_id(1)

    @pl.when(k == 0)
    def _():
        acc_ref[...] = jnp.zeros_like(acc_ref)

    acc_ref[...] += jnp.dot(x_ref[...], at_ref[...],
                            preferred_element_type=jnp.float32)

    @pl.when(k == pl.num_programs(1) - 1)
    def _():
        xa_ref[...] = acc_ref[...].astype(xa_ref.dtype)


# --------------------------------------------------------------------------
# Main kernel: out = x @ W.T + bias + xa @ (scale * B.T)
# grid = (M-tiles, N-tiles, K-tiles); no cross-j state, so M and N are both
# safe to mark "parallel".
# --------------------------------------------------------------------------
def _lora_linear_kernel(x_ref, wt_ref, b_ref, xa_ref, bt_ref, o_ref, acc_ref):
    k = pl.program_id(2)

    @pl.when(k == 0)
    def _():
        # Fold bias + LoRA up-projection into accumulator init so the final
        # step is only a cast + store (better overlap with output writeback).
        acc_ref[...] = b_ref[...] + jnp.dot(
            xa_ref[...], bt_ref[...], preferred_element_type=jnp.float32)

    acc_ref[...] += jnp.dot(x_ref[...], wt_ref[...],
                            preferred_element_type=jnp.float32)

    @pl.when(k == pl.num_programs(2) - 1)
    def _():
        o_ref[...] = acc_ref[...].astype(o_ref.dtype)


# --------------------------------------------------------------------------
# One-time weight packing (do this at weight-load time and cache the result;
# it materializes W.T once instead of on every forward call).
# --------------------------------------------------------------------------
def pack_lora_weights(W, b, A, B, *, alpha=16, r=8,
                      tn=1024, tk=512, compute_dtype=jnp.bfloat16):
    out_f, in_f = W.shape
    scale = float(alpha) / float(r)

    tk = min(tk, _round_up(in_f, 128))
    tn = min(tn, _round_up(out_f, 128))
    in_pad = _round_up(in_f, tk)
    out_pad = _round_up(out_f, tn)
    r_pad = _round_up(max(r, 128), 128)

    Wt = jnp.pad(W.T.astype(compute_dtype),
                 ((0, in_pad - in_f), (0, out_pad - out_f)))
    # Bias kept in f32: it is added directly into the f32 accumulator.
    b2 = jnp.pad(b.reshape(1, out_f).astype(jnp.float32),
                 ((0, 0), (0, out_pad - out_f)))
    At = jnp.pad(A.T.astype(compute_dtype),
                 ((0, in_pad - in_f), (0, r_pad - r)))
    # Fold alpha/r into B.T once (no per-tile VPU scale in the kernel).
    Bt = jnp.pad((B.T * scale).astype(compute_dtype),
                 ((0, r_pad - r), (0, out_pad - out_f)))

    return {
        "Wt": Wt, "b2": b2, "At": At, "Bt": Bt,
        "in_f": in_f, "out_f": out_f,
        "in_pad": in_pad, "out_pad": out_pad, "r_pad": r_pad,
        "tn": tn, "tk": tk, "compute_dtype": compute_dtype,
    }


# --------------------------------------------------------------------------
# Forward with pre-packed weights.
# --------------------------------------------------------------------------
def lora_linear_packed(x, packed, *, tm=512, out_dtype=None):
    M, in_f = x.shape
    assert in_f == packed["in_f"], "in_features mismatch with packed weights"

    cd = packed["compute_dtype"]
    out_dtype = x.dtype if out_dtype is None else out_dtype
    tn, tk = packed["tn"], packed["tk"]
    in_pad, out_pad, r_pad = packed["in_pad"], packed["out_pad"], packed["r_pad"]

    # bf16 blocks want a 16-row sublane multiple; f32 wants 8.
    sublane = 16 if jnp.dtype(cd).itemsize == 2 else 8
    tm = min(tm, _round_up(M, sublane))
    m_pad = _round_up(M, tm)

    xp = jnp.pad(x.astype(cd), ((0, m_pad - M), (0, in_pad - in_f)))

    # ---- LoRA down-projection: xa = x @ A.T (f32 accumulate, cast to cd) ----
    xa = pl.pallas_call(
        _lora_down_kernel,
        out_shape=jax.ShapeDtypeStruct((m_pad, r_pad), cd),
        grid_spec=pltpu.PrefetchScalarGridSpec(
            num_scalar_prefetch=0,
            grid=(m_pad // tm, in_pad // tk),
            in_specs=[
                pl.BlockSpec((tm, tk), lambda i, k: (i, k)),      # x tile
                pl.BlockSpec((tk, r_pad), lambda i, k: (k, 0)),   # A.T tile
            ],
            out_specs=pl.BlockSpec((tm, r_pad), lambda i, k: (i, 0)),
            scratch_shapes=[pltpu.VMEM((tm, r_pad), jnp.float32)],
        ),
        compiler_params=pltpu.CompilerParams(
            dimension_semantics=("parallel", "arbitrary")),
    )(xp, packed["At"])

    # ---- VMEM budget for the main kernel (double-buffered in/out + acc) ----
    itemsize = jnp.dtype(cd).itemsize
    out_itemsize = jnp.dtype(out_dtype).itemsize
    vmem_est = (2 * (tm * tk + tk * tn + tm * r_pad + r_pad * tn) * itemsize
                + 2 * tn * 4                       # bias (f32)
                + 2 * tm * tn * out_itemsize       # output
                + tm * tn * 4)                     # f32 accumulator scratch
    vmem_limit = 32 * 1024 * 1024                  # fits v5e/v6e/v7x physically
    assert vmem_est <= vmem_limit, (
        f"tile config needs ~{vmem_est} B VMEM > limit {vmem_limit} B; "
        f"shrink tm/tn/tk")

    # ---- Main fused kernel ----
    out = pl.pallas_call(
        _lora_linear_kernel,
        out_shape=jax.ShapeDtypeStruct((m_pad, out_pad), out_dtype),
        grid_spec=pltpu.PrefetchScalarGridSpec(
            num_scalar_prefetch=0,
            grid=(m_pad // tm, out_pad // tn, in_pad // tk),
            in_specs=[
                pl.BlockSpec((tm, tk), lambda i, j, k: (i, k)),       # x tile
                pl.BlockSpec((tk, tn), lambda i, j, k: (k, j)),       # W.T tile
                pl.BlockSpec((1, tn), lambda i, j, k: (0, j)),        # bias tile
                pl.BlockSpec((tm, r_pad), lambda i, j, k: (i, 0)),    # xa tile
                pl.BlockSpec((r_pad, tn), lambda i, j, k: (0, j)),    # scaled B.T
            ],
            out_specs=pl.BlockSpec((tm, tn), lambda i, j, k: (i, j)),
            scratch_shapes=[pltpu.VMEM((tm, tn), jnp.float32)],
        ),
        compiler_params=pltpu.CompilerParams(
            # No cross-j state anymore: both M and N axes are parallel (megacore
            # sharding on v7x even when m_pad//tm == 1); K is the reduction.
            dimension_semantics=("parallel", "parallel", "arbitrary"),
            vmem_limit_bytes=vmem_limit),
    )(xp, packed["Wt"], packed["b2"], xa, packed["Bt"])

    return out[:M, :packed["out_f"]]


# --------------------------------------------------------------------------
# Convenience wrapper (packs weights per call — cache pack_lora_weights()
# output in production to avoid re-materializing W.T every forward).
# --------------------------------------------------------------------------
def lora_linear(x, W, b, A, B, *, alpha=16, r=8, tm=512, tn=1024, tk=512,
                compute_dtype=jnp.bfloat16, out_dtype=None):
    packed = pack_lora_weights(W, b, A, B, alpha=alpha, r=r, tn=tn, tk=tk,
                               compute_dtype=compute_dtype)
    return lora_linear_packed(x, packed, tm=tm, out_dtype=out_dtype)


if __name__ == "__main__":
    # Small shapes implied by the module: a Linear applied to (batch, seq, in).
    batch, seq, in_features, out_features, r, alpha = 2, 8, 32, 64, 8, 16

    key = jax.random.PRNGKey(0)
    kx, kw, kb, ka, kB = jax.random.split(key, 5)

    x = jax.random.normal(kx, (batch, seq, in_features), dtype=jnp.float32)
    W = jax.random.normal(kw, (out_features, in_features), dtype=jnp.float32) * 0.1
    b = jax.random.normal(kb, (out_features,), dtype=jnp.float32) * 0.1
    A = jax.random.normal(ka, (r, in_features), dtype=jnp.float32) * 0.01
    B = jax.random.normal(kB, (out_features, r), dtype=jnp.float32) * 0.01

    x2d = x.reshape(batch * seq, in_features)

    # Pure-JAX reference (eval-mode dropout = identity).
    scale = alpha / r
    ref = x @ W.T + b + scale * ((x @ A.T) @ B.T)

    # f32 operand path: tight match against the f32 reference.
    out_f32 = lora_linear(x2d, W, b, A, B, alpha=alpha, r=r,
                          compute_dtype=jnp.float32)
    out_f32 = out_f32.reshape(batch, seq, out_features)
    jax.block_until_ready(out_f32)
    assert jnp.allclose(out_f32, ref, atol=1e-4, rtol=1e-4), "f32 mismatch"

    # Default production path: bf16 operands, f32 accumulation, f32 output.
    out_bf16 = lora_linear(x2d, W, b, A, B, alpha=alpha, r=r)
    out_bf16 = out_bf16.reshape(batch, seq, out_features)
    jax.block_until_ready(out_bf16)
    assert jnp.allclose(out_bf16, ref, atol=5e-2, rtol=5e-2), "bf16 mismatch"

    print("KERNEL_OK")
</pallas_src>

<mosaic_0001>
module attributes {stable_mosaic.version = 11 : i64} {
  func.func @_lora_down_kernel(%arg0: i32, %arg1: i32, %arg2: memref<16x128xf32, #tpu.memory_space<vmem>>, %arg3: memref<128x128xf32, #tpu.memory_space<vmem>>, %arg4: memref<16x128xf32, #tpu.memory_space<vmem>>, %arg5: memref<16x128xf32, #tpu.memory_space<vmem>>) attributes {dimension_semantics = [#tpu.dimension_semantics<parallel>, #tpu.dimension_semantics<arbitrary>], iteration_bounds = array<i64: 1, 1>, scalar_prefetch = 0 : i64, scratch_operands = 1 : i64, tpu.core_type = #tpu.core_type<tc>, window_params = [{transform_indices = @transform_0, window_bounds = array<i64: 16, 128>}, {transform_indices = @transform_1, window_bounds = array<i64: 128, 128>}, {transform_indices = @transform_2, window_bounds = array<i64: 16, 128>}]} {
    %c0_i32 = arith.constant 0 : i32
    %0 = arith.cmpi eq, %arg1, %c0_i32 : i32
    %1 = arith.extui %0 : i1 to i32
    %c0_i32_0 = arith.constant 0 : i32
    %2 = arith.cmpi ne, %1, %c0_i32_0 : i32
    scf.if %2 {
      %cst_10 = arith.constant 0.000000e+00 : f32
      %12 = vector.broadcast %cst_10 : f32 to vector<16x128xf32>
      %c0_11 = arith.constant 0 : index
      %c0_12 = arith.constant 0 : index
      %13 = vector.load %arg5[%c0_11, %c0_12] : memref<16x128xf32, #tpu.memory_space<vmem>>, vector<16x128xf32>
      tpu.vector_store %arg5[%c0_11, %c0_12], %12 {strides = array<i32>} : memref<16x128xf32, #tpu.memory_space<vmem>>, vector<16x128xf32>,
    } else {
    }
    %c0 = arith.constant 0 : index
    %c0_1 = arith.constant 0 : index
    %3 = vector.load %arg5[%c0, %c0_1] : memref<16x128xf32, #tpu.memory_space<vmem>>, vector<16x128xf32>
    %c0_2 = arith.constant 0 : index
    %c0_3 = arith.constant 0 : index
    %4 = vector.load %arg2[%c0_2, %c0_3] : memref<16x128xf32, #tpu.memory_space<vmem>>, vector<16x128xf32>
    %c0_4 = arith.constant 0 : index
    %c0_5 = arith.constant 0 : index
    %5 = vector.load %arg3[%c0_4, %c0_5] : memref<128x128xf32, #tpu.memory_space<vmem>>, vector<128x128xf32>
    %cst = arith.constant dense<0.000000e+00> : vector<16x128xf32>
    %6 = tpu.matmul %4, %5, %cst {dimension_numbers = #tpu.dot_dimension_numbers<[1], [0], [0], [1], [0, 0, 1, 1], [], []>} : vector<16x128xf32>, vector<128x128xf32>, vector<16x128xf32> -> vector<16x128xf32>
    %7 = arith.addf %3, %6 : vector<16x128xf32>
    %c0_6 = arith.constant 0 : index
    %c0_7 = arith.constant 0 : index
    %8 = vector.load %arg5[%c0_6, %c0_7] : memref<16x128xf32, #tpu.memory_space<vmem>>, vector<16x128xf32>
    tpu.vector_store %arg5[%c0_6, %c0_7], %7 {strides = array<i32>} : memref<16x128xf32, #tpu.memory_space<vmem>>, vector<16x128xf32>,
    %c0_i32_8 = arith.constant 0 : i32
    %9 = arith.cmpi eq, %arg1, %c0_i32_8 : i32
    %10 = arith.extui %9 : i1 to i32
    %c0_i32_9 = arith.constant 0 : i32
    %11 = arith.cmpi ne, %10, %c0_i32_9 : i32
    scf.if %11 {
      %c0_10 = arith.constant 0 : index
      %c0_11 = arith.constant 0 : index
      %12 = vector.load %arg5[%c0_10, %c0_11] : memref<16x128xf32, #tpu.memory_space<vmem>>, vector<16x128xf32>
      %c0_12 = arith.constant 0 : index
      %c0_13 = arith.constant 0 : index
      %13 = vector.load %arg4[%c0_12, %c0_13] : memref<16x128xf32, #tpu.memory_space<vmem>>, vector<16x128xf32>
      tpu.vector_store %arg4[%c0_12, %c0_13], %12 {strides = array<i32>} : memref<16x128xf32, #tpu.memory_space<vmem>>, vector<16x128xf32>,
    } else {
    }
    return
  }
  func.func @transform_0(%arg0: i32, %arg1: i32) -> (i32, i32) {
    %c0_i32 = arith.constant 0 : i32
    return %arg0, %arg1 : i32, i32
  }
  func.func @transform_1(%arg0: i32, %arg1: i32) -> (i32, i32) {
    %c0_i32 = arith.constant 0 : i32
    %c0_i32_0 = arith.constant 0 : i32
    return %arg1, %c0_i32 : i32, i32
  }
  func.func @transform_2(%arg0: i32, %arg1: i32) -> (i32, i32) {
    %c0_i32 = arith.constant 0 : i32
    %c0_i32_0 = arith.constant 0 : i32
    return %arg0, %c0_i32 : i32, i32
  }
}

</mosaic_0001>

<bundles_post_ra>
// kernel: tpu_custom_call.1
= control target key start
LH: loop header
LB: loop body
LE: loop exit
PB: predicated region body
PF: predicated region fallthrough
CT: control target
= control target key end

     0   :  { %7 = vsyncpa [#allocation4], 0  ;;  %s332_s0 = inlined_call_operand.hbm [shape: f32[16,128], index: 0, kind: input, shape index: {}]   ;;  %s333_s1 = inlined_call_operand.hbm [shape: f32[128,128], index: 1, kind: input, shape index: {}]   ;;  %s334_s2 = inlined_call_operand.hbm [shape: f32[16,128], index: 2, kind: output, shape index: {}]  }
   0x1   :  { %8 = vsyncpa [#allocation7], 0 }
   0x2   :  { %9 = vsyncpa [#allocation5], 0  ;;  %s294_s9 = smov [#allocation3]  }
   0x3   :  { %s15_s10 = sshll.u32 %s294_s9, 4  ;;  %s16_s10 = int_to_ptr.vmem [resolvable:$true] %s15_s10 }
   0x4   :  { %s236_s11 = scalar_lea.vmem %s16_s10, 256  ;;  %p241_p1 = scmp.lt.s32.totalorder %s16_s10, %s16_s10 }
   0x5   :  { %p237_p0 = scmp.ne.s32.totalorder %s16_s10, %s236_s11  ;;  %p242_p2 = scmp.lt.s32.totalorder %s236_s11, %s236_s11 }
   0x7   :  { %p243_p3 = por %p242_p2, %p241_p1 }
   0x9   :  { %p244_p4 = pnand %p243_p3, %p237_p0 }
   0xb   :  { %247 = shalt.err (!%p244_p4)
}
   0xc   :  { %s295_s12 = smov 128   ;;  %s296_s13 = smov 8  }
   0xd   :  { %21 = dma.hbm_to_vmem [thread:$0]  %s332_s0, 256, %s16_s10, [#allocation4], %s295_s12, %s295_s12, %s296_s13  }
   0xe   :  { %s297_s16 = smov [#allocation6]  }
   0xf   :  { %s27_s17 = sshll.u32 %s297_s16, 4  ;;  %s28_s17 = int_to_ptr.vmem [resolvable:$true] %s27_s17 }
  0x10   :  { %s256_s18 = scalar_lea.vmem %s28_s17, 2048  ;;  %p261_p6 = scmp.lt.s32.totalorder %s28_s17, %s28_s17 }
  0x11   :  { %p257_p5 = scmp.ne.s32.totalorder %s28_s17, %s256_s18  ;;  %p262_p7 = scmp.lt.s32.totalorder %s256_s18, %s256_s18 }
  0x13   :  { %p263_p8 = por %p262_p7, %p261_p6 }
  0x15   :  { %p264_p9 = pnand %p263_p8, %p257_p5 }
  0x17   :  { %267 = shalt.err (!%p264_p9)
}
  0x18   :  { %33 = dma.hbm_to_vmem [thread:$0]  %s333_s1, 2048, %s28_s17, [#allocation7], %s295_s12, %s295_s12, %s296_s13  }
  0x19   :  { %288 = dma.done.wait [#allocation4], 256  }
  0x1a   :  { %289 = vsyncadd [#allocation4], 4294967040 }
  0x1b   :  { %290 = dma.done.wait [#allocation7], 2048  }
  0x1c   :  { %291 = vsyncadd [#allocation7], 4294965248  ;;  %v65_v0 = vld [vmem:[#allocation6 + $0x78] sm:$0xff]  ;;  %v64_v1 = vld [vmem:[#allocation6 + $0x70] sm:$0xff]  ;;  %s298_s0 = smov [#allocation8]  }
  0x1d   :  { %188 = vmatprep.subr.mxu0 %v65_v0  ;;  %v63_v2 = vld [vmem:[#allocation6 + $0x68] sm:$0xff]  ;;  %v62_v3 = vld [vmem:[#allocation6 + $0x60] sm:$0xff]  ;;  %v48_v4 = vld [vmem:[#allocation3] sm:$0xff]  ;;  %s157_s1 = sshll.u32 %s298_s0, 4  ;;  %s158_s1 = int_to_ptr.vmem [resolvable:$true] %s157_s1 }
  0x1e   :  { %189 = vmatpush3.msra.mxu0 %v65_v0  ;;  %v61_v5 = vld [vmem:[#allocation6 + $0x58] sm:$0xff]  ;;  %220 = vmatprep.mubr.f32.mxu0 %v48_v4  ;;  %v60_v6 = vld [vmem:[#allocation6 + $0x50] sm:$0xff]  ;;  %v59_v7 = vld [vmem:[#allocation6 + $0x48] sm:$0xff]  ;;  %s268_s21 = scalar_lea.vmem %s158_s1, 256  ;;  %p273_p11 = scmp.lt.s32.totalorder %s158_s1, %s158_s1 }
  0x1f   :  { %190 = vmatprep.subr.mxu0 %v64_v1  ;;  %v58_v8 = vld [vmem:[#allocation6 + $0x40] sm:$0xff]  ;;  %v57_v9 = vld [vmem:[#allocation6 + $0x38] sm:$0xff]  ;;  %v56_v10 = vld [vmem:[#allocation6 + $0x30] sm:$0xff]  ;;  %p269_p10 = scmp.ne.s32.totalorder %s158_s1, %s268_s21  ;;  %p274_p12 = scmp.lt.s32.totalorder %s268_s21, %s268_s21 }
  0x20   :  { %191 = vmatpush3.msra.mxu0 %v64_v1  ;;  %v55_v11 = vld [vmem:[#allocation6 + $0x28] sm:$0xff]  ;;  %v54_v12 = vld [vmem:[#allocation6 + $0x20] sm:$0xff]  ;;  %v53_v13 = vld [vmem:[#allocation6 + $0x18] sm:$0xff] }
  0x21   :  { %192 = vmatprep.subr.mxu0 %v63_v2  ;;  %v52_v14 = vld [vmem:[#allocation6 + $0x10] sm:$0xff]  ;;  %v51_v15 = vld [vmem:[#allocation6 + $0x8] sm:$0xff]  ;;  %v50_v16 = vld [vmem:[#allocation6] sm:$0xff]  ;;  %p275_p13 = por %p274_p12, %p273_p11 }
  0x22   :  { %193 = vmatpush3.msra.mxu0 %v63_v2  ;;  %v49_v17 = vld [vmem:[#allocation3 + $0x8] sm:$0xff] }
  0x23   :  { %194 = vmatprep.subr.mxu0 %v62_v3  ;;  %p276_p0 = pnand %p275_p13, %p269_p10 }
  0x24   :  { %195 = vmatpush3.msra.mxu0 %v62_v3 }
  0x25   :  { %196 = vmatprep.subr.mxu0 %v61_v5 }
  0x26   :  { %197 = vmatpush3.msra.mxu0 %v61_v5 }
  0x27   :  { %198 = vmatprep.subr.mxu0 %v60_v6 }
  0x28   :  { %199 = vmatpush3.msra.mxu0 %v60_v6 }
  0x29   :  { %200 = vmatprep.subr.mxu0 %v59_v7 }
  0x2a   :  { %201 = vmatpush3.msra.mxu0 %v59_v7 }
  0x2b   :  { %202 = vmatprep.subr.mxu0 %v58_v8 }
  0x2c   :  { %203 = vmatpush3.msra.mxu0 %v58_v8 }
  0x2d   :  { %204 = vmatprep.subr.mxu0 %v57_v9 }
  0x2e   :  { %205 = vmatpush3.msra.mxu0 %v57_v9 }
  0x2f   :  { %206 = vmatprep.subr.mxu0 %v56_v10 }
  0x30   :  { %207 = vmatpush3.msra.mxu0 %v56_v10 }
  0x31   :  { %208 = vmatprep.subr.mxu0 %v55_v11 }
  0x32   :  { %209 = vmatpush3.msra.mxu0 %v55_v11 }
  0x33   :  { %210 = vmatprep.subr.mxu0 %v54_v12 }
  0x34   :  { %211 = vmatpush3.msra.mxu0 %v54_v12 }
  0x35   :  { %212 = vmatprep.subr.mxu0 %v53_v13 }
  0x36   :  { %213 = vmatpush3.msra.mxu0 %v53_v13 }
  0x37   :  { %214 = vmatprep.subr.mxu0 %v52_v14 }
  0x38   :  { %215 = vmatpush3.msra.mxu0 %v52_v14 }
  0x39   :  { %216 = vmatprep.subr.mxu0 %v51_v15 }
  0x3a   :  { %217 = vmatpush3.msra.mxu0 %v51_v15 }
  0x3b   :  { %218 = vmatprep.subr.mxu0 %v50_v16 }
  0x3c   :  { %219 = vmatpush3.msra.mxu0 %v50_v16 }
  0x3d   :  { %221 = vmatmul.mubr.f32.vlgmr.msra.gmra.mxu0 %v49_v17 }
  0xfd   :  { %v222_v18 = vpop.f32.mrf.mxu0 }
  0xfe   :  { %151 = vst [vmem:[#allocation8 + $0x8] sm:$0xff] %v222_v18 }
  0xff   :  { %v132_v19 = vpop.f32.mrf.mxu0 }
 0x100   :  { %150 = vst [vmem:[#allocation8] sm:$0xff] %v132_v19 }
 0x101   :  { %279 = shalt.err (!%p276_p0)
}
 0x102   :  { %163 = dma.vmem_to_hbm [thread:$0]  %s158_s1, 256, %s334_s2, [#allocation5], %s295_s12, %s295_s12, %s296_s13  }
 0x103   :  { %292 = dma.done.wait [#allocation5], 256  }
 0x104   :  { %293 = vsyncadd [#allocation5], 4294967040 }
 0x105   :  { %167 = vsyncpa [#allocation4], 1 }
 0x106   :  { %168 = vsyncpa [#allocation7], 1 }
 0x107   :  { %169 = vsyncpa [#allocation5], 1 }

</bundles_post_ra>
